<compile_context>
chip_gen: v6e
topology: v6e:2x2x1
jax: 0.10.0
libtpu: 0.0.40
codegen_flags: <defaults>
</compile_context>

<pallas_src>
import functools

import jax
import jax.numpy as jnp
from jax.experimental import pallas as pl
from jax.experimental.pallas import tpu as pltpu


def _round_up(x, m):
    return ((x + m - 1) // m) * m


def _cdiv(a, b):
    return (a + b - 1) // b


# Encoder Linear is computed on the VPU (broadcast FMAs) instead of the MXU when
# the pooled channel count is this small (tiny-K dots waste near-empty MXU passes).
_VPU_ENCODER_MAX_C = 16


def _tpu_config():
    """(max batch tile, vmem_limit_bytes), keyed off this generation's physical VMEM."""
    vmem_cap = None
    try:
        vmem_cap = int(pltpu.get_tpu_info().vmem_capacity_bytes)
    except Exception:
        vmem_cap = None
    if vmem_cap is None:
        try:
            kind = jax.devices()[0].device_kind.lower()
            vmem_cap = (128 << 20) if any(t in kind for t in ("v5", "v6")) else (64 << 20)
        except Exception:
            vmem_cap = 64 << 20
    if vmem_cap >= (100 << 20):        # v5e / v6e: 128 MiB physical VMEM
        return 1024, 96 << 20
    return 512, 48 << 20               # v7x: 64 MiB physical VMEM


_MAX_TILE_B, _VMEM_LIMIT_BYTES = _tpu_config()


def _probe_single_buffering():
    """Compile a tiny kernel to verify pipeline_mode=pl.Buffered(1) is supported."""
    def _copy(x_ref, o_ref):
        o_ref[...] = x_ref[...]
    try:
        fn = pl.pallas_call(
            _copy,
            out_shape=jax.ShapeDtypeStruct((16, 128), jnp.float32),
            grid=(2,),
            in_specs=[pl.BlockSpec((8, 128), lambda i: (0, 0),
                                   pipeline_mode=pl.Buffered(1))],
            out_specs=pl.BlockSpec((8, 128), lambda i: (i, 0)),
        )
        jax.block_until_ready(fn(jnp.zeros((16, 128), jnp.float32)))
        return True
    except Exception:
        return False


_SINGLE_BUFFER_WEIGHTS = _probe_single_buffering()


# ----------------------------------------------------------------------------
# Pallas kernel: encoder linear + concat-folded fusion MLP, all fused.
# ----------------------------------------------------------------------------
def _fusion_kernel(p1_ref, p2_ref,                 # (TB, C)  pooled images
                   wenc_ref, benc_ref,             # (C, 1280), (1, 1280)
                   w1a_ref, w1b_ref,               # (1280, 1280) bf16 each ([even|odd] cols)
                   b1p_ref,                        # (1, 1280) f32   ([even|odd])
                   w2e_ref, w2o_ref,               # (640, 160) bf16 each
                   b2e_ref, b2o_ref,               # (1, 160) f32 each
                   w3_ref,                         # (1, 160) f32 row vector
                   out_ref,                        # (TB, 1)  f32
                   *, vpu_encoder):
    f32 = jnp.float32
    bf16 = jnp.bfloat16

    # --- synthetic encoder (GAP done in wrapper): Linear(C,1280) + ReLU ------
    if vpu_encoder:
        # Tiny K: keep the encoder off the MXU.  C broadcast FMAs on the VPU
        # (plenty of VALU slack under the 1280x1280 dots), all in f32.
        p1 = p1_ref[...]
        p2 = p2_ref[...]
        wenc = wenc_ref[...]
        c_in = wenc.shape[0]
        f1 = p1[:, 0:1] * wenc[0:1, :]
        f2 = p2[:, 0:1] * wenc[0:1, :]
        for c in range(1, c_in):
            f1 = f1 + p1[:, c:c + 1] * wenc[c:c + 1, :]
            f2 = f2 + p2[:, c:c + 1] * wenc[c:c + 1, :]
        f1 = jnp.maximum(f1 + benc_ref[...], 0.0)
        f2 = jnp.maximum(f2 + benc_ref[...], 0.0)
    else:
        # Large C: MXU path; activations already bf16 (cast in the wrapper).
        f1 = jnp.maximum(
            jnp.dot(p1_ref[...], wenc_ref[...], preferred_element_type=f32)
            + benc_ref[...], 0.0)
        f2 = jnp.maximum(
            jnp.dot(p2_ref[...], wenc_ref[...], preferred_element_type=f32)
            + benc_ref[...], 0.0)

    # --- Linear(2560,1280) + MaxPool1d(2,2) + ReLU (Dropout = identity) ------
    # torch.cat((x_1, x_2), 1) is folded as two row-blocks of W1 (w1a / w1b);
    # MaxPool1d is folded as a max over the [even | odd] column halves.
    h1f = (jnp.dot(f1.astype(bf16), w1a_ref[...], preferred_element_type=f32)
           + jnp.dot(f2.astype(bf16), w1b_ref[...], preferred_element_type=f32)
           + b1p_ref[...])                                            # (TB, 1280)
    h1 = jnp.maximum(jnp.maximum(h1f[:, :640], h1f[:, 640:]), 0.0)    # (TB, 640)

    # --- Linear(640,320) + MaxPool1d(2,2) + ReLU (Dropout = identity) --------
    h1b = h1.astype(bf16)
    h2e = jnp.dot(h1b, w2e_ref[...], preferred_element_type=f32) + b2e_ref[...]
    h2o = jnp.dot(h1b, w2o_ref[...], preferred_element_type=f32) + b2o_ref[...]
    h2 = jnp.maximum(jnp.maximum(h2e, h2o), 0.0)                      # (TB, 160)

    # --- Linear(160, 1, bias=False): VPU multiply + lane reduction -----------
    out_ref[...] = jnp.sum(h2 * w3_ref[...], axis=-1, keepdims=True)


# ----------------------------------------------------------------------------
# Parameter construction (deterministic, PyTorch-default-style uniform init).
# ----------------------------------------------------------------------------
def _uniform(key, shape, fan_in):
    bound = 1.0 / jnp.sqrt(jnp.float32(fan_in))
    return jax.random.uniform(key, shape, jnp.float32, -bound, bound)


def make_params(key, c_in):
    ks = jax.random.split(key, 8)
    params = {}
    # synthetic encoder: Linear(c_in, 1280), stored (in, out)
    params["wenc"] = _uniform(ks[0], (c_in, 1280), c_in)
    params["benc"] = _uniform(ks[1], (1, 1280), c_in)
    # fusion: Linear(2560, 1280) — torch layout (out, in)
    params["w1"] = _uniform(ks[2], (1280, 2560), 2560)
    params["b1"] = _uniform(ks[3], (1280,), 2560)
    # fusion: Linear(640, 320)
    params["w2"] = _uniform(ks[4], (320, 640), 640)
    params["b2"] = _uniform(ks[5], (320,), 640)
    # fusion: Linear(160, 1, bias=False)
    params["w3"] = _uniform(ks[6], (1, 160), 160)
    return params


def pack_params(params):
    """One-time packing: fold MaxPool1d (even/odd) + concat, cast MXU weights bf16."""
    w1, b1 = params["w1"], params["b1"]                    # (1280, 2560), (1280,)
    # Reorder output rows to [even | odd], then transpose to (in, out).
    w1p_t = jnp.transpose(jnp.concatenate([w1[0::2], w1[1::2]], axis=0))  # (2560, 1280)
    c_in = params["wenc"].shape[0]
    vpu_encoder = c_in <= _VPU_ENCODER_MAX_C
    # Keep the tiny encoder weight in f32 on the VPU path (extra precision,
    # negligible bytes); bf16 when it feeds the MXU.
    wenc_dtype = jnp.float32 if vpu_encoder else jnp.bfloat16
    return dict(
        wenc=params["wenc"].astype(wenc_dtype),                           # (C, 1280)
        benc=params["benc"].astype(jnp.float32),                          # (1, 1280)
        w1a=w1p_t[:1280].astype(jnp.bfloat16),                            # multiplies f1
        w1b=w1p_t[1280:].astype(jnp.bfloat16),                            # multiplies f2
        b1p=jnp.concatenate([b1[0::2], b1[1::2]])[None, :].astype(jnp.float32),
        w2e=jnp.transpose(params["w2"][0::2]).astype(jnp.bfloat16),       # (640, 160)
        w2o=jnp.transpose(params["w2"][1::2]).astype(jnp.bfloat16),       # (640, 160)
        b2e=params["b2"][0::2][None, :].astype(jnp.float32),              # (1, 160)
        b2o=params["b2"][1::2][None, :].astype(jnp.float32),              # (1, 160)
        w3=params["w3"].astype(jnp.float32),                              # (1, 160)
    )


def _const_spec(shape):
    """Weight block: constant index map (stays VMEM-resident across grid steps),
    single-buffered where the installed Pallas supports pipeline_mode=Buffered(1)."""
    idx = lambda i: (0, 0)
    if _SINGLE_BUFFER_WEIGHTS:
        return pl.BlockSpec(shape, idx, pipeline_mode=pl.Buffered(1))
    return pl.BlockSpec(shape, idx)


# ----------------------------------------------------------------------------
# Wrapper
# ----------------------------------------------------------------------------
@jax.jit
def fusion_model_forward(x1, x2, packed):
    """x1, x2: (B, C, H, W) float32 NCHW images. packed: from pack_params()."""
    B, C, H, W = x1.shape
    vpu_encoder = C <= _VPU_ENCODER_MAX_C

    # Global average pool (synthetic-encoder stem) in XLA so the kernel only
    # DMAs (B, C) activations instead of (B, C, H*W).  Activations go in bf16
    # on the MXU path (halves activation DMA, removes per-tile casts).
    act_dtype = jnp.float32 if vpu_encoder else jnp.bfloat16
    p1 = jnp.mean(x1.reshape(B, C, H * W).astype(jnp.float32), axis=-1).astype(act_dtype)
    p2 = jnp.mean(x2.reshape(B, C, H * W).astype(jnp.float32), axis=-1).astype(act_dtype)

    # Batch padding / tiling: sublane-aligned tiles.  Guarantee >= 2 (even #)
    # grid steps whenever there are >= 16 padded rows so the "parallel" batch
    # axis shards across both v7x TensorCores; single-TC chips only pay one
    # extra ~0.35us grid step.
    Bp = _round_up(B, 8)
    if Bp >= 16:
        n_steps = max(2, _cdiv(Bp, _MAX_TILE_B))
        if n_steps % 2:
            n_steps += 1
        tile_b = _round_up(_cdiv(Bp, n_steps), 8)
    else:
        tile_b = Bp
    Bp = _round_up(Bp, tile_b)
    if Bp != B:
        p1 = jnp.pad(p1, ((0, Bp - B), (0, 0)))
        p2 = jnp.pad(p2, ((0, Bp - B), (0, 0)))
    grid = (Bp // tile_b,)

    act_spec = pl.BlockSpec((tile_b, C), lambda i: (i, 0))
    in_specs = [
        act_spec, act_spec,
        _const_spec((C, 1280)), _const_spec((1, 1280)),
        _const_spec((1280, 1280)), _const_spec((1280, 1280)), _const_spec((1, 1280)),
        _const_spec((640, 160)), _const_spec((640, 160)),
        _const_spec((1, 160)), _const_spec((1, 160)),
        _const_spec((1, 160)),
    ]
    out_specs = pl.BlockSpec((tile_b, 1), lambda i: (i, 0))

    # Advisory cost estimate for XLA scheduling around the kernel.
    flops = 2 * Bp * (2 * C * 1280 + 2 * 1280 * 1280 + 2 * 640 * 160 + 160)
    weight_bytes = sum(int(v.size) * v.dtype.itemsize for v in packed.values())
    bytes_accessed = weight_bytes + 2 * Bp * C * p1.dtype.itemsize + Bp * 4

    out = pl.pallas_call(
        functools.partial(_fusion_kernel, vpu_encoder=vpu_encoder),
        out_shape=jax.ShapeDtypeStruct((Bp, 1), jnp.float32),
        grid=grid,
        in_specs=in_specs,
        out_specs=out_specs,
        compiler_params=pltpu.CompilerParams(
            dimension_semantics=("parallel",),
            vmem_limit_bytes=_VMEM_LIMIT_BYTES,
        ),
        cost_estimate=pl.CostEstimate(
            flops=flops, transcendentals=0, bytes_accessed=bytes_accessed),
    )(p1, p2,
      packed["wenc"], packed["benc"],
      packed["w1a"], packed["w1b"], packed["b1p"],
      packed["w2e"], packed["w2o"], packed["b2e"], packed["b2o"],
      packed["w3"])

    out = out[:B, 0]                       # (B,)  (padded garbage rows sliced off)
    # torch .squeeze(): (B,) for B > 1, 0-d scalar for B == 1.
    return out if B > 1 else out[0]


# ----------------------------------------------------------------------------
# Pure-JAX reference (mirrors the PyTorch forward, eval mode, f32 weights)
# ----------------------------------------------------------------------------
def reference_forward(x1, x2, params):
    B, C, H, W = x1.shape

    def enc(x):
        pooled = jnp.mean(x.reshape(B, C, H * W), axis=-1)
        return jnp.maximum(pooled @ params["wenc"] + params["benc"], 0.0)

    feats = jnp.concatenate([enc(x1), enc(x2)], axis=1)            # (B, 2560)
    h = feats @ params["w1"].T + params["b1"]                      # (B, 1280)
    h = jnp.max(h.reshape(B, 640, 2), axis=-1)                     # MaxPool1d(2,2)
    h = jnp.maximum(h, 0.0)                                        # ReLU (Dropout=id)
    h = h @ params["w2"].T + params["b2"]                          # (B, 320)
    h = jnp.max(h.reshape(B, 160, 2), axis=-1)
    h = jnp.maximum(h, 0.0)
    out = h @ params["w3"].T                                       # (B, 1)
    return jnp.squeeze(out, axis=-1)


if __name__ == "__main__":
    key = jax.random.PRNGKey(0)
    k_x1, k_x2, k_p = jax.random.split(key, 3)

    B, C, H, W = 2, 4, 16, 16
    x1 = jax.random.normal(k_x1, (B, C, H, W), jnp.float32)
    x2 = jax.random.normal(k_x2, (B, C, H, W), jnp.float32)

    params = make_params(k_p, C)
    packed = pack_params(params)          # one-time weight packing (outside jit/forward)

    out = fusion_model_forward(x1, x2, packed)
    out = jax.block_until_ready(out)

    ref = reference_forward(x1, x2, params)
    assert out.shape == (B,), out.shape
    # Kernel stores MXU weights / runs big matmuls in bf16 (f32 accumulate);
    # compare against the f32 reference with a tolerance covering bf16 quantization.
    assert jnp.allclose(out, ref, atol=3e-2, rtol=3e-2), (out, ref)

    print("KERNEL_OK")
</pallas_src>

<mosaic_0001>
module attributes {stable_mosaic.version = 11 : i64} {
  func.func @_copy(%arg0: i32, %arg1: memref<8x128xf32, #tpu.memory_space<vmem>>, %arg2: memref<8x128xf32, #tpu.memory_space<vmem>>) attributes {dimension_semantics = [#tpu.dimension_semantics<arbitrary>], iteration_bounds = array<i64: 2>, scalar_prefetch = 0 : i64, scratch_operands = 0 : i64, tpu.core_type = #tpu.core_type<tc>, window_params = [{pipeline_mode = #tpu.pipeline_mode<synchronous>, transform_indices = @transform_0, window_bounds = array<i64: 8, 128>}, {transform_indices = @transform_1, window_bounds = array<i64: 8, 128>}]} {
    %c0 = arith.constant 0 : index
    %c0_0 = arith.constant 0 : index
    %0 = vector.load %arg1[%c0, %c0_0] : memref<8x128xf32, #tpu.memory_space<vmem>>, vector<8x128xf32>
    %c0_1 = arith.constant 0 : index
    %c0_2 = arith.constant 0 : index
    %1 = vector.load %arg2[%c0_1, %c0_2] : memref<8x128xf32, #tpu.memory_space<vmem>>, vector<8x128xf32>
    tpu.vector_store %arg2[%c0_1, %c0_2], %0 {strides = array<i32>} : memref<8x128xf32, #tpu.memory_space<vmem>>, vector<8x128xf32>,
    return
  }
  func.func @transform_0(%arg0: i32) -> (i32, i32) {
    %c0_i32 = arith.constant 0 : i32
    %c0_i32_0 = arith.constant 0 : i32
    %c0_i32_1 = arith.constant 0 : i32
    return %c0_i32, %c0_i32_0 : i32, i32
  }
  func.func @transform_1(%arg0: i32) -> (i32, i32) {
    %c0_i32 = arith.constant 0 : i32
    %c0_i32_0 = arith.constant 0 : i32
    return %arg0, %c0_i32 : i32, i32
  }
}

module attributes {stable_mosaic.version = 11 : i64} {
  func.func @_fusion_kernel(%arg0: i32, %arg1: memref<8x4xf32, #tpu.memory_space<vmem>>, %arg2: memref<8x4xf32, #tpu.memory_space<vmem>>, %arg3: memref<4x1280xf32, #tpu.memory_space<vmem>>, %arg4: memref<1x1280xf32, #tpu.memory_space<vmem>>, %arg5: memref<1280x1280xbf16, #tpu.memory_space<vmem>>, %arg6: memref<1280x1280xbf16, #tpu.memory_space<vmem>>, %arg7: memref<1x1280xf32, #tpu.memory_space<vmem>>, %arg8: memref<640x160xbf16, #tpu.memory_space<vmem>>, %arg9: memref<640x160xbf16, #tpu.memory_space<vmem>>, %arg10: memref<1x160xf32, #tpu.memory_space<vmem>>, %arg11: memref<1x160xf32, #tpu.memory_space<vmem>>, %arg12: memref<1x160xf32, #tpu.memory_space<vmem>>, %arg13: memref<8x1xf32, #tpu.memory_space<vmem>>) attributes {dimension_semantics = [#tpu.dimension_semantics<parallel>], iteration_bounds = array<i64: 1>, scalar_prefetch = 0 : i64, scratch_operands = 0 : i64, tpu.core_type = #tpu.core_type<tc>, window_params = [{transform_indices = @transform_0, window_bounds = array<i64: 8, 4>}, {transform_indices = @transform_1, window_bounds = array<i64: 8, 4>}, {pipeline_mode = #tpu.pipeline_mode<synchronous>, transform_indices = @transform_2, window_bounds = array<i64: 4, 1280>}, {pipeline_mode = #tpu.pipeline_mode<synchronous>, transform_indices = @transform_3, window_bounds = array<i64: 1, 1280>}, {pipeline_mode = #tpu.pipeline_mode<synchronous>, transform_indices = @transform_4, window_bounds = array<i64: 1280, 1280>}, {pipeline_mode = #tpu.pipeline_mode<synchronous>, transform_indices = @transform_5, window_bounds = array<i64: 1280, 1280>}, {pipeline_mode = #tpu.pipeline_mode<synchronous>, transform_indices = @transform_6, window_bounds = array<i64: 1, 1280>}, {pipeline_mode = #tpu.pipeline_mode<synchronous>, transform_indices = @transform_7, window_bounds = array<i64: 640, 160>}, {pipeline_mode = #tpu.pipeline_mode<synchronous>, transform_indices = @transform_8, window_bounds = array<i64: 640, 160>}, {pipeline_mode = #tpu.pipeline_mode<synchronous>, transform_indices = @transform_9, window_bounds = array<i64: 1, 160>}, {pipeline_mode = #tpu.pipeline_mode<synchronous>, transform_indices = @transform_10, window_bounds = array<i64: 1, 160>}, {pipeline_mode = #tpu.pipeline_mode<synchronous>, transform_indices = @transform_11, window_bounds = array<i64: 1, 160>}, {transform_indices = @transform_12, window_bounds = array<i64: 8, 1>}]} {
    %c0 = arith.constant 0 : index
    %c0_0 = arith.constant 0 : index
    %0 = vector.load %arg1[%c0, %c0_0] : memref<8x4xf32, #tpu.memory_space<vmem>>, vector<8x4xf32>
    %c0_1 = arith.constant 0 : index
    %c0_2 = arith.constant 0 : index
    %1 = vector.load %arg2[%c0_1, %c0_2] : memref<8x4xf32, #tpu.memory_space<vmem>>, vector<8x4xf32>
    %c0_3 = arith.constant 0 : index
    %c0_4 = arith.constant 0 : index
    %2 = vector.load %arg3[%c0_3, %c0_4] : memref<4x1280xf32, #tpu.memory_space<vmem>>, vector<4x1280xf32>
    %3 = vector.extract_strided_slice %0 {offsets = [0, 0], sizes = [8, 1], strides = [1, 1]} : vector<8x4xf32> to vector<8x1xf32>
    %4 = vector.extract_strided_slice %2 {offsets = [0, 0], sizes = [1, 1280], strides = [1, 1]} : vector<4x1280xf32> to vector<1x1280xf32>
    %5 = vector.broadcast %3 : vector<8x1xf32> to vector<8x1280xf32>
    %6 = vector.broadcast %4 : vector<1x1280xf32> to vector<8x1280xf32>
    %7 = arith.mulf %5, %6 : vector<8x1280xf32>
    %8 = vector.extract_strided_slice %1 {offsets = [0, 0], sizes = [8, 1], strides = [1, 1]} : vector<8x4xf32> to vector<8x1xf32>
    %9 = vector.extract_strided_slice %2 {offsets = [0, 0], sizes = [1, 1280], strides = [1, 1]} : vector<4x1280xf32> to vector<1x1280xf32>
    %10 = vector.broadcast %8 : vector<8x1xf32> to vector<8x1280xf32>
    %11 = vector.broadcast %9 : vector<1x1280xf32> to vector<8x1280xf32>
    %12 = arith.mulf %10, %11 : vector<8x1280xf32>
    %13 = vector.extract_strided_slice %0 {offsets = [0, 1], sizes = [8, 1], strides = [1, 1]} : vector<8x4xf32> to vector<8x1xf32>
    %14 = vector.extract_strided_slice %2 {offsets = [1, 0], sizes = [1, 1280], strides = [1, 1]} : vector<4x1280xf32> to vector<1x1280xf32>
    %15 = vector.broadcast %13 : vector<8x1xf32> to vector<8x1280xf32>
    %16 = vector.broadcast %14 : vector<1x1280xf32> to vector<8x1280xf32>
    %17 = arith.mulf %15, %16 : vector<8x1280xf32>
    %18 = arith.addf %7, %17 : vector<8x1280xf32>
    %19 = vector.extract_strided_slice %1 {offsets = [0, 1], sizes = [8, 1], strides = [1, 1]} : vector<8x4xf32> to vector<8x1xf32>
    %20 = vector.extract_strided_slice %2 {offsets = [1, 0], sizes = [1, 1280], strides = [1, 1]} : vector<4x1280xf32> to vector<1x1280xf32>
    %21 = vector.broadcast %19 : vector<8x1xf32> to vector<8x1280xf32>
    %22 = vector.broadcast %20 : vector<1x1280xf32> to vector<8x1280xf32>
    %23 = arith.mulf %21, %22 : vector<8x1280xf32>
    %24 = arith.addf %12, %23 : vector<8x1280xf32>
    %25 = vector.extract_strided_slice %0 {offsets = [0, 2], sizes = [8, 1], strides = [1, 1]} : vector<8x4xf32> to vector<8x1xf32>
    %26 = vector.extract_strided_slice %2 {offsets = [2, 0], sizes = [1, 1280], strides = [1, 1]} : vector<4x1280xf32> to vector<1x1280xf32>
    %27 = vector.broadcast %25 : vector<8x1xf32> to vector<8x1280xf32>
    %28 = vector.broadcast %26 : vector<1x1280xf32> to vector<8x1280xf32>
    %29 = arith.mulf %27, %28 : vector<8x1280xf32>
    %30 = arith.addf %18, %29 : vector<8x1280xf32>
    %31 = vector.extract_strided_slice %1 {offsets = [0, 2], sizes = [8, 1], strides = [1, 1]} : vector<8x4xf32> to vector<8x1xf32>
    %32 = vector.extract_strided_slice %2 {offsets = [2, 0], sizes = [1, 1280], strides = [1, 1]} : vector<4x1280xf32> to vector<1x1280xf32>
    %33 = vector.broadcast %31 : vector<8x1xf32> to vector<8x1280xf32>
    %34 = vector.broadcast %32 : vector<1x1280xf32> to vector<8x1280xf32>
    %35 = arith.mulf %33, %34 : vector<8x1280xf32>
    %36 = arith.addf %24, %35 : vector<8x1280xf32>
    %37 = vector.extract_strided_slice %0 {offsets = [0, 3], sizes = [8, 1], strides = [1, 1]} : vector<8x4xf32> to vector<8x1xf32>
    %38 = vector.extract_strided_slice %2 {offsets = [3, 0], sizes = [1, 1280], strides = [1, 1]} : vector<4x1280xf32> to vector<1x1280xf32>
    %39 = vector.broadcast %37 : vector<8x1xf32> to vector<8x1280xf32>
    %40 = vector.broadcast %38 : vector<1x1280xf32> to vector<8x1280xf32>
    %41 = arith.mulf %39, %40 : vector<8x1280xf32>
    %42 = arith.addf %30, %41 : vector<8x1280xf32>
    %43 = vector.extract_strided_slice %1 {offsets = [0, 3], sizes = [8, 1], strides = [1, 1]} : vector<8x4xf32> to vector<8x1xf32>
    %44 = vector.extract_strided_slice %2 {offsets = [3, 0], sizes = [1, 1280], strides = [1, 1]} : vector<4x1280xf32> to vector<1x1280xf32>
    %45 = vector.broadcast %43 : vector<8x1xf32> to vector<8x1280xf32>
    %46 = vector.broadcast %44 : vector<1x1280xf32> to vector<8x1280xf32>
    %47 = arith.mulf %45, %46 : vector<8x1280xf32>
    %48 = arith.addf %36, %47 : vector<8x1280xf32>
    %c0_5 = arith.constant 0 : index
    %c0_6 = arith.constant 0 : index
    %49 = vector.load %arg4[%c0_5, %c0_6] : memref<1x1280xf32, #tpu.memory_space<vmem>>, vector<1x1280xf32>
    %50 = vector.broadcast %49 : vector<1x1280xf32> to vector<8x1280xf32>
    %51 = arith.addf %42, %50 : vector<8x1280xf32>
    %cst = arith.constant 0.000000e+00 : f32
    %52 = vector.broadcast %cst : f32 to vector<8x1280xf32>
    %53 = arith.maximumf %51, %52 : vector<8x1280xf32>
    %c0_7 = arith.constant 0 : index
    %c0_8 = arith.constant 0 : index
    %54 = vector.load %arg4[%c0_7, %c0_8] : memref<1x1280xf32, #tpu.memory_space<vmem>>, vector<1x1280xf32>
    %55 = vector.broadcast %54 : vector<1x1280xf32> to vector<8x1280xf32>
    %56 = arith.addf %48, %55 : vector<8x1280xf32>
    %cst_9 = arith.constant 0.000000e+00 : f32
    %57 = vector.broadcast %cst_9 : f32 to vector<8x1280xf32>
    %58 = arith.maximumf %56, %57 : vector<8x1280xf32>
    %59 = arith.truncf %53 : vector<8x1280xf32> to vector<8x1280xbf16>
    %c0_10 = arith.constant 0 : index
    %c0_11 = arith.constant 0 : index
    %60 = vector.load %arg5[%c0_10, %c0_11] : memref<1280x1280xbf16, #tpu.memory_space<vmem>>, vector<1280x1280xbf16>
    %cst_12 = arith.constant dense<0.000000e+00> : vector<8x1280xf32>
    %61 = tpu.matmul %59, %60, %cst_12 {dimension_numbers = #tpu.dot_dimension_numbers<[1], [0], [0], [1], [0, 0, 1, 1], [], []>} : vector<8x1280xbf16>, vector<1280x1280xbf16>, vector<8x1280xf32> -> vector<8x1280xf32>
    %62 = arith.truncf %58 : vector<8x1280xf32> to vector<8x1280xbf16>
    %c0_13 = arith.constant 0 : index
    %c0_14 = arith.constant 0 : index
    %63 = vector.load %arg6[%c0_13, %c0_14] : memref<1280x1280xbf16, #tpu.memory_space<vmem>>, vector<1280x1280xbf16>
    %cst_15 = arith.constant dense<0.000000e+00> : vector<8x1280xf32>
    %64 = tpu.matmul %62, %63, %cst_15 {dimension_numbers = #tpu.dot_dimension_numbers<[1], [0], [0], [1], [0, 0, 1, 1], [], []>} : vector<8x1280xbf16>, vector<1280x1280xbf16>, vector<8x1280xf32> -> vector<8x1280xf32>
    %65 = arith.addf %61, %64 : vector<8x1280xf32>
    %c0_16 = arith.constant 0 : index
    %c0_17 = arith.constant 0 : index
    %66 = vector.load %arg7[%c0_16, %c0_17] : memref<1x1280xf32, #tpu.memory_space<vmem>>, vector<1x1280xf32>
    %67 = vector.broadcast %66 : vector<1x1280xf32> to vector<8x1280xf32>
    %68 = arith.addf %65, %67 : vector<8x1280xf32>
    %69 = vector.extract_strided_slice %68 {offsets = [0, 0], sizes = [8, 640], strides = [1, 1]} : vector<8x1280xf32> to vector<8x640xf32>
    %70 = vector.extract_strided_slice %68 {offsets = [0, 640], sizes = [8, 640], strides = [1, 1]} : vector<8x1280xf32> to vector<8x640xf32>
    %71 = arith.maximumf %69, %70 : vector<8x640xf32>
    %cst_18 = arith.constant 0.000000e+00 : f32
    %72 = vector.broadcast %cst_18 : f32 to vector<8x640xf32>
    %73 = arith.maximumf %71, %72 : vector<8x640xf32>
    %74 = arith.truncf %73 : vector<8x640xf32> to vector<8x640xbf16>
    %c0_19 = arith.constant 0 : index
    %c0_20 = arith.constant 0 : index
    %75 = vector.load %arg8[%c0_19, %c0_20] : memref<640x160xbf16, #tpu.memory_space<vmem>>, vector<640x160xbf16>
    %cst_21 = arith.constant dense<0.000000e+00> : vector<8x160xf32>
    %76 = tpu.matmul %74, %75, %cst_21 {dimension_numbers = #tpu.dot_dimension_numbers<[1], [0], [0], [1], [0, 0, 1, 1], [], []>} : vector<8x640xbf16>, vector<640x160xbf16>, vector<8x160xf32> -> vector<8x160xf32>
    %c0_22 = arith.constant 0 : index
    %c0_23 = arith.constant 0 : index
    %77 = vector.load %arg10[%c0_22, %c0_23] : memref<1x160xf32, #tpu.memory_space<vmem>>, vector<1x160xf32>
    %78 = vector.broadcast %77 : vector<1x160xf32> to vector<8x160xf32>
    %79 = arith.addf %76, %78 : vector<8x160xf32>
    %c0_24 = arith.constant 0 : index
    %c0_25 = arith.constant 0 : index
    %80 = vector.load %arg9[%c0_24, %c0_25] : memref<640x160xbf16, #tpu.memory_space<vmem>>, vector<640x160xbf16>
    %cst_26 = arith.constant dense<0.000000e+00> : vector<8x160xf32>
    %81 = tpu.matmul %74, %80, %cst_26 {dimension_numbers = #tpu.dot_dimension_numbers<[1], [0], [0], [1], [0, 0, 1, 1], [], []>} : vector<8x640xbf16>, vector<640x160xbf16>, vector<8x160xf32> -> vector<8x160xf32>
    %c0_27 = arith.constant 0 : index
    %c0_28 = arith.constant 0 : index
    %82 = vector.load %arg11[%c0_27, %c0_28] : memref<1x160xf32, #tpu.memory_space<vmem>>, vector<1x160xf32>
    %83 = vector.broadcast %82 : vector<1x160xf32> to vector<8x160xf32>
    %84 = arith.addf %81, %83 : vector<8x160xf32>
    %85 = arith.maximumf %79, %84 : vector<8x160xf32>
    %cst_29 = arith.constant 0.000000e+00 : f32
    %86 = vector.broadcast %cst_29 : f32 to vector<8x160xf32>
    %87 = arith.maximumf %85, %86 : vector<8x160xf32>
    %c0_30 = arith.constant 0 : index
    %c0_31 = arith.constant 0 : index
    %88 = vector.load %arg12[%c0_30, %c0_31] : memref<1x160xf32, #tpu.memory_space<vmem>>, vector<1x160xf32>
    %89 = vector.broadcast %88 : vector<1x160xf32> to vector<8x160xf32>
    %90 = arith.mulf %87, %89 : vector<8x160xf32>
    %cst_32 = arith.constant dense<0.000000e+00> : vector<8xf32>
    %91 = vector.multi_reduction <add>, %90, %cst_32 [1] : vector<8x160xf32> to vector<8xf32>
    %92 = vector.shape_cast %91 : vector<8xf32> to vector<8x1xf32>
    %c0_33 = arith.constant 0 : index
    %c0_34 = arith.constant 0 : index
    %93 = vector.load %arg13[%c0_33, %c0_34] : memref<8x1xf32, #tpu.memory_space<vmem>>, vector<8x1xf32>
    tpu.vector_store %arg13[%c0_33, %c0_34], %92 {strides = array<i32>} : memref<8x1xf32, #tpu.memory_space<vmem>>, vector<8x1xf32>,
    return
  }
  func.func @transform_0(%arg0: i32) -> (i32, i32) {
    %c0_i32 = arith.constant 0 : i32
    %c0_i32_0 = arith.constant 0 : i32
    return %arg0, %c0_i32 : i32, i32
  }
  func.func @transform_1(%arg0: i32) -> (i32, i32) {
    %c0_i32 = arith.constant 0 : i32
    %c0_i32_0 = arith.constant 0 : i32
    return %arg0, %c0_i32 : i32, i32
  }
  func.func @transform_2(%arg0: i32) -> (i32, i32) {
    %c0_i32 = arith.constant 0 : i32
    %c0_i32_0 = arith.constant 0 : i32
    %c0_i32_1 = arith.constant 0 : i32
    return %c0_i32, %c0_i32_0 : i32, i32
  }
  func.func @transform_3(%arg0: i32) -> (i32, i32) {
    %c0_i32 = arith.constant 0 : i32
    %c0_i32_0 = arith.constant 0 : i32
    %c0_i32_1 = arith.constant 0 : i32
    return %c0_i32, %c0_i32_0 : i32, i32
  }
  func.func @transform_4(%arg0: i32) -> (i32, i32) {
    %c0_i32 = arith.constant 0 : i32
    %c0_i32_0 = arith.constant 0 : i32
    %c0_i32_1 = arith.constant 0 : i32
    return %c0_i32, %c0_i32_0 : i32, i32
  }
  func.func @transform_5(%arg0: i32) -> (i32, i32) {
    %c0_i32 = arith.constant 0 : i32
    %c0_i32_0 = arith.constant 0 : i32
    %c0_i32_1 = arith.constant 0 : i32
    return %c0_i32, %c0_i32_0 : i32, i32
  }
  func.func @transform_6(%arg0: i32) -> (i32, i32) {
    %c0_i32 = arith.constant 0 : i32
    %c0_i32_0 = arith.constant 0 : i32
    %c0_i32_1 = arith.constant 0 : i32
    return %c0_i32, %c0_i32_0 : i32, i32
  }
  func.func @transform_7(%arg0: i32) -> (i32, i32) {
    %c0_i32 = arith.constant 0 : i32
    %c0_i32_0 = arith.constant 0 : i32
    %c0_i32_1 = arith.constant 0 : i32
    return %c0_i32, %c0_i32_0 : i32, i32
  }
  func.func @transform_8(%arg0: i32) -> (i32, i32) {
    %c0_i32 = arith.constant 0 : i32
    %c0_i32_0 = arith.constant 0 : i32
    %c0_i32_1 = arith.constant 0 : i32
    return %c0_i32, %c0_i32_0 : i32, i32
  }
  func.func @transform_9(%arg0: i32) -> (i32, i32) {
    %c0_i32 = arith.constant 0 : i32
    %c0_i32_0 = arith.constant 0 : i32
    %c0_i32_1 = arith.constant 0 : i32
    return %c0_i32, %c0_i32_0 : i32, i32
  }
  func.func @transform_10(%arg0: i32) -> (i32, i32) {
    %c0_i32 = arith.constant 0 : i32
    %c0_i32_0 = arith.constant 0 : i32
    %c0_i32_1 = arith.constant 0 : i32
    return %c0_i32, %c0_i32_0 : i32, i32
  }
  func.func @transform_11(%arg0: i32) -> (i32, i32) {
    %c0_i32 = arith.constant 0 : i32
    %c0_i32_0 = arith.constant 0 : i32
    %c0_i32_1 = arith.constant 0 : i32
    return %c0_i32, %c0_i32_0 : i32, i32
  }
  func.func @transform_12(%arg0: i32) -> (i32, i32) {
    %c0_i32 = arith.constant 0 : i32
    %c0_i32_0 = arith.constant 0 : i32
    return %arg0, %c0_i32 : i32, i32
  }
}

</mosaic_0001>

<bundles_post_ra>
// kernel: tpu_custom_call.1
= control target key start
LH: loop header
LB: loop body
LE: loop exit
PB: predicated region body
PF: predicated region fallthrough
CT: control target
= control target key end

     0   :  { %6 = vsyncpa [#allocation3], 0  ;;  %s453_s0 = inlined_call_operand.hbm [shape: f32[16,128], index: 0, kind: input, shape index: {}]   ;;  %s454_s1 = inlined_call_operand.hbm [shape: f32[16,128], index: 1, kind: output, shape index: {}]  }
   0x1   :  { %7 = vsyncpa [#allocation4], 0 }
   0x2   :  { %9 = vsyncpa [#allocation4 + $0x1], 0  ;;  %s347_s6 = smov 0   ;;  %s349_s7 = smov 0  }
   0x3   :  { %s351_s8 = smov 0   ;;  %s353_s9 = smov 0  }
   0x4 LB: > { %s368_s10 = sadd.s32 4294967295, %s333_s9   ;;  %s183_s11 = sadd.s32 4294967294, %s333_s9   ;;  %s333_s9 = sphi %s353_s9, %s462_s9   ;;  %s329_s8 = sphi %s351_s8, %s461_s8   ;;  %s325_s7 = sphi %s349_s7, %s460_s7   ;;  %s321_s6 = sphi %s347_s6, %s459_s6  }
   0x5   : > { %s372_s12 = sadd.s32 1, %s333_s9   ;;  %s43_s13 = sadd.s32 1, %s329_s8 }
   0x6   : > { %s40_s14 = ssub.s32 %s333_s9, %s372_s12  ;;  %p53_p0 = scmp.ne.s32.totalorder %s329_s8, %s325_s7 }
   0x7   : > { %p41_p1 = scmp.eq.s32.totalorder %s40_s14, 0  ;;  %p54_p2 = scmp.eq.s32.totalorder %s368_s10, 1 }
   0x8   : > { %p59_p3 = scmp.ne.s32.totalorder %s325_s7, %s321_s6  ;;  %p60_p4 = scmp.eq.s32.totalorder %s183_s11, 1 }
   0x9   : > { %s383_s15 = scalar_select %p41_p1, %s329_s8, %s43_s13  }
   0xa   : > { %p385_p5 = por %p54_p2, %p53_p0  ;;  %p389_p6 = por %p60_p4, %p59_p3 }
   0xb   : > { %p184_p7 = scmp.ge.s32.totalorder %s333_s9, 1  ;;  %p67_p8 = scmp.lt.s32.totalorder %s333_s9, 3 }
   0xc   : > { %s456_s17 = scalar_select %p389_p6, 1, 0 }
   0xd   : > { %p207_p9 = scmp.eq.s32.totalorder %s368_s10, 0  ;;  %p396_p10 = pnand %p184_p7, %p67_p8 }
   0xe   : > { %s335_s19 = smov [#allocation2]  }
   0xf   : > { %s80_s20 = sshll.u32 %s335_s19, 4  ;;  %p199_p11 = pneg %p396_p10  ;;  %s81_s20 = int_to_ptr.vmem [resolvable:$true] %s80_s20 }
  0x10   : > { %s254_s21 = scalar_lea.vmem %s81_s20, 128  ;;  %p262_p3 = scmp.lt.s32.totalorder %s81_s20, %s81_s20 }
  0x11   : > { %p200_p12 = pnand %p207_p9, %p199_p11  ;;  %p255_p0 = scmp.ne.s32.totalorder %s81_s20, %s254_s21 }
  0x12   : > { %p263_p4 = scmp.lt.s32.totalorder %s254_s21, %s254_s21 }
  0x13   : > { %p245_p13 = pneg %p200_p12 }
  0x14   : > { %p264_p6 = por %p263_p4, %p262_p3 }
  0x15   : > { %p257_p1 = pnand %p255_p0, %p245_p13 }
  0x17   : > { %p258_p2 = pneg %p257_p1 }
  0x19   : > { %p265_p7 = pnand %p264_p6, %p258_p2 }
  0x1b   : > { %268 = shalt.err (!%p265_p7)
}
  0x1c   : > { %202 = dma.hbm_to_vmem [thread:$0]  (!%p200_p12), %s453_s0, 128, %s81_s20, [#allocation3]  }
  0x1d   : > { %93 = sbr.rel (%p396_p10) target bundleno = 60 (0x3c), region = 24 }
  0x22   : > { %312 = dma.done.wait (%p207_p9), [#allocation3], 128  }
  0x23   : > { %314 = vsyncadd (%p207_p9), [#allocation3], 4294967168  ;;  %s105_s24 = sand.u32 1, %s325_s7   ;;  %s190_s28 = sshll.u32 %s368_s10, 7  ;;  %v108_v0 = vld [vmem:[#allocation2] sm:$0xff] }
  0x24   : > { %s188_s25 = sshll.u32 %s105_s24, 3  ;;  %s122_s2 = scalar_lea.hbm %s454_s1, %s190_s28 }
  0x25   : > { %s107_s26 = scalar_lea.vmem [#allocation5], %s188_s25  ;;  %s111_s3 = scalar_lea.sflag [#allocation4], %s105_s24 }
  0x26   : > { %s124_s27 = sshll.u32 %s107_s26, 4  ;;  %109 = vst [vmem:[%s107_s26] sm:$0xff] %v108_v0  ;;  %s336_s5 = smov [#allocation5]   ;;  %s415_s27 = int_to_ptr.vmem [resolvable:$true] %s124_s27 }
  0x27   : > { %s269_s4 = scalar_lea.vmem %s415_s27, 128  ;;  %s273_s11 = sshll.u32 %s336_s5, 4  ;;  %s274_s11 = int_to_ptr.vmem [resolvable:$false] %s273_s11 }
  0x28   : > { %p270_p6 = scmp.ne.s32.totalorder %s415_s27, %s269_s4  ;;  %s275_s10 = scalar_lea.vmem %s274_s11, 256 }
  0x29   : > { %p276_p10 = scmp.lt.s32.totalorder %s415_s27, %s274_s11  ;;  %p277_p11 = scmp.lt.s32.totalorder %s275_s10, %s269_s4 }
  0x2a   : > { %p271_p8 = pnand %p270_p6, %p385_p5 }
  0x2b   : > { %p278_p12 = por %p277_p11, %p276_p10 }
  0x2c   : > { %p272_p9 = pneg %p271_p8 }
  0x2e   : > { %p279_p13 = pnand %p278_p12, %p272_p9 }
  0x30   : > { %282 = shalt.err (!%p279_p13)
}
  0x31   : > { %s283_s13 = scalar_lea.hbm %s122_s2, 128  ;;  %s287_s19 = scalar_lea.hbm %s454_s1, 256 }
  0x32   : > { %p284_p0 = scmp.ne.s32.totalorder %s122_s2, %s283_s13  ;;  %p288_p3 = scmp.lt.s32.totalorder %s122_s2, %s454_s1 }
  0x33   : > { %p289_p4 = scmp.lt.s32.totalorder %s287_s19, %s283_s13 }
  0x34   : > { %p285_p1 = pnand %p284_p0, %p385_p5 }
  0x35   : > { %p290_p7 = por %p289_p4, %p288_p3 }
  0x36   : > { %p286_p2 = pneg %p285_p1 }
  0x38   : > { %p291_p6 = pnand %p290_p7, %p286_p2 }
  0x3a   : > { %294 = shalt.err (!%p291_p6)
}
  0x3b   : > { %197 = dma.vmem_to_hbm [thread:$0]  (%p385_p5), %s415_s27, 128, %s122_s2, %s111_s3  }
  0x3c PF: > { %p209_p8 = scmp.ge.s32.totalorder %s333_s9, 2  ;;  %s136_s22 = sand.u32 1, %s321_s6  }
  0x3d   : > { %p458_p9 = scmp.ne.s32.totalorder %s456_s17, 0  ;;  %s137_s23 = scalar_lea.sflag [#allocation4], %s136_s22 }
  0x3f   : > { %p204_p10 = pnand %p209_p8, %p458_p9 }
  0x41   : > { %p205_p11 = pneg %p204_p10 }
  0x43   : > { %316 = dma.done.wait (%p205_p11), %s137_s23, 128  }
  0x44   : > { %318 = vsyncadd (%p205_p11), %s137_s23, 4294967168  ;;  %p12_p12 = scmp.ge.s32.totalorder %s372_s12, 4   ;;  %s459_s6 = smov %s325_s7 }
  0x45   : > { %s460_s7 = smov %s329_s8  ;;  %s461_s8 = smov %s383_s15 }
  0x46   : > { %s462_s9 = smov %s372_s12  ;;  %14 = sbr.rel (!%p12_p12) target bundleno = 4 (0x4), region = 61 }
  0x4b   :  { %142 = vsyncpa [#allocation3], 1 }
  0x4c   :  { %144 = vsyncpa [#allocation3 + $0x1], 1 }
  0x4d   :  { %145 = vsyncpa [#allocation4], 1 }
  0x4e   :  { %147 = vsyncpa [#allocation4 + $0x1], 1 }

</bundles_post_ra>
